<compile_context>
chip_gen: v7x
topology: tpu7x:2x2x1
jax: 0.10.0
libtpu: 0.0.40
codegen_flags: <defaults>
</compile_context>

<pallas_src>
import functools

import jax
import jax.numpy as jnp
from jax.experimental import pallas as pl
from jax.experimental.pallas import tpu as pltpu

B, C, E = 8, 4, 32     # batch, channels, embedding_dim
H = 32                 # hidden width of the synthetic bacteria_nn / viral_nn
D = 16                 # output_dim
CE = C * E             # flattened per-sub-net input width (128)
EPS = 1e-5             # BatchNorm1d eps
BIAS_ROWS = 8          # packed (always-f32) bias buffer rows
R_HEAD = 2 * CE        # row offset of the folded head weight inside the slab


def _phinn_kernel(has_skip_x, bflat_ref, vflat_ref, w_ref, bias_ref, out_ref):
    """has_skip_x is a static Python bool (skip_connection and not skip_only)."""
    f32 = jnp.float32
    head_rows = 2 * H + (CE if has_skip_x else 0)

    bflat = bflat_ref[...]                                  # (B, CE)
    vflat = vflat_ref[...]                                  # (B, CE)

    # weight-slab views (static ref slices -> no copies); lanes past the true
    # width are zero padding and never read
    wb1 = w_ref[0:CE, 0:H]                                  # (CE, H)
    wv1 = w_ref[CE:2 * CE, 0:H]                             # (CE, H)
    w_head = w_ref[R_HEAD:R_HEAD + head_rows, 0:D]          # (2H[+CE], D)

    bias = bias_ref[...]                                    # (BIAS_ROWS, 128) f32
    b1 = bias[0:1, 0:2 * H]                                 # [bb1 | bv1]
    bhead = bias[1:2, 0:D]                                  # fully-folded head bias
    gamma = bias[2:3, 0:D]                                  # BN weight
    beta = bias[3:4, 0:D]                                   # BN bias
    wfc2 = bias[4:5, 0:D]                                   # fc2 weight as a row
    bfc2 = bias[5:6, 0:1]                                   # fc2 bias

    # ---- bacteria_nn / viral_nn layer 1: two independent K=CE matmuls ----
    hb = jnp.dot(bflat, wb1, preferred_element_type=f32)    # (B, H)
    hv = jnp.dot(vflat, wv1, preferred_element_type=f32)    # (B, H)
    h = jnp.maximum(jnp.concatenate([hb, hv], axis=1) + b1, 0.0)   # (B, 2H)

    # ---- layer 2 + head (fc / fc_skip_only / fc_skip) folded into ONE matmul ----
    if has_skip_x:
        # skip path folded offline into rows [2H, 2H+CE) of w_head
        lhs = jnp.concatenate([h, bflat.astype(f32)], axis=1)        # (B, 2H+CE)
    else:
        lhs = h
    out = jnp.dot(lhs, w_head, preferred_element_type=f32) + bhead   # (B, D)

    # ---- BatchNorm1d (training mode: batch stats) as a single scale/shift ----
    mean = jnp.mean(out, axis=0, keepdims=True)
    var = jnp.mean((out - mean) ** 2, axis=0, keepdims=True)
    scale = gamma * jax.lax.rsqrt(var + EPS)
    shift = beta - mean * scale
    out = jnp.maximum(out * scale + shift, 0.0)

    # ---- fc2 on the VPU (mul + lane reduce) + sigmoid ----
    logits = jnp.sum(out * wfc2, axis=1, keepdims=True) + bfc2        # (B, 1)
    out_ref[...] = jax.nn.sigmoid(logits).astype(out_ref.dtype)


def _block_diag(a, b):
    m, n = a.shape
    p, q = b.shape
    z = jnp.zeros((m + p, n + q), a.dtype)
    return z.at[:m, :n].set(a).at[m:, n:].set(b)


def pack_params(params, *, skip_connection=False, skip_only=False,
                param_dtype=jnp.float32):
    """Build the two kernel operands (weight slab + always-f32 bias buffer).

    Run once at parameter-setup time.  Only weights needed by the statically
    chosen branch are packed; everything foldable offline (layer-2, head
    selection, channel-sum skip path) is folded here.
    """
    (wb1, bb1, wb2, bb2, wv1, bv1, wv2, bv2, wfc, bfc,
     ws_only, bs_only, ws0, bs0, wskip, bskip, gamma, beta, wfc2, bfc2) = params
    has_skip_x = bool(skip_connection and not skip_only)

    wskipx = None
    if skip_only:
        # (PyTorch also computes fc_skip0 here but discards the result -> omitted)
        whead, bhead = ws_only, bs_only
    elif skip_connection:
        # Faithful to the PyTorch code: bacteria_input used for BOTH skip halves.
        # channel-sum + fc_skip0 + fc_skip[:2D] fold into one (CE, D) weight
        # applied directly to the already-flattened bacteria input.
        w0s = ws0[:E, :] + ws0[E:, :]                          # (E, 2D)
        wskipx = jnp.tile(w0s @ wskip[:2 * D, :], (C, 1))      # (CE, D)
        whead = wskip[2 * D:, :]                               # (2D, D)
        bhead = bs0 @ wskip[:2 * D, :] + bskip                 # (1, D)
    else:
        whead, bhead = wfc, bfc

    # fold layer-2 (block-diag of wb2 / wv2) into the head matmul
    w2_bd = _block_diag(wb2, wv2)                              # (2H, 2D)
    b2 = jnp.concatenate([bb2, bv2], axis=1)                   # (1, 2D)
    w2h = w2_bd @ whead                                        # (2H, D)
    bhead2 = b2 @ whead + bhead                                # (1, D)
    w_head = jnp.concatenate([w2h, wskipx], axis=0) if has_skip_x else w2h

    head_rows = w_head.shape[0]                                # 64 or 192
    total_rows = R_HEAD + head_rows                            # 320 or 448 (tile-aligned)

    wslab = jnp.zeros((total_rows, 128), jnp.float32)
    wslab = wslab.at[0:CE, 0:H].set(wb1.reshape(CE, H))
    wslab = wslab.at[CE:2 * CE, 0:H].set(wv1.reshape(CE, H))
    wslab = wslab.at[R_HEAD:R_HEAD + head_rows, 0:D].set(w_head)

    bias = jnp.zeros((BIAS_ROWS, 128), jnp.float32)
    bias = bias.at[0, 0:2 * H].set(jnp.concatenate([bb1, bv1], axis=1)[0])
    bias = bias.at[1, 0:D].set(bhead2[0])
    bias = bias.at[2, 0:D].set(gamma[0])
    bias = bias.at[3, 0:D].set(beta[0])
    bias = bias.at[4, 0:D].set(wfc2[:, 0])
    bias = bias.at[5, 0:1].set(bfc2[0])
    return wslab.astype(param_dtype), bias


def phinn_forward(bx, vx, packed, *, skip_connection=False, skip_only=False):
    wslab, bias = packed
    has_skip_x = bool(skip_connection and not skip_only)
    bflat = bx.reshape(B, CE).astype(wslab.dtype)     # free reshape, no concat
    vflat = vx.reshape(B, CE).astype(wslab.dtype)
    kernel = functools.partial(_phinn_kernel, has_skip_x)
    vmem = pl.BlockSpec(memory_space=pltpu.MemorySpace.VMEM)
    return pl.pallas_call(
        kernel,
        out_shape=jax.ShapeDtypeStruct((B, 1), jnp.float32),
        in_specs=[vmem, vmem, vmem, vmem],
        out_specs=vmem,
    )(bflat, vflat, wslab, bias)


def init_params(key):
    """Deterministic PyTorch-style (uniform +/- 1/sqrt(fan_in)) initialization."""
    ks = jax.random.split(key, 16)

    def lin(k, fan_in, shape):
        bound = 1.0 / float(fan_in) ** 0.5
        return jax.random.uniform(k, shape, jnp.float32, -bound, bound)

    wb1 = lin(ks[0], C * E, (C, E, H)); bb1 = lin(ks[1], C * E, (1, H))
    wb2 = lin(ks[2], H, (H, D));        bb2 = lin(ks[3], H, (1, D))
    wv1 = lin(ks[4], C * E, (C, E, H)); bv1 = lin(ks[5], C * E, (1, H))
    wv2 = lin(ks[6], H, (H, D));        bv2 = lin(ks[7], H, (1, D))
    wfc = lin(ks[8], 2 * D, (2 * D, D));        bfc = lin(ks[9], 2 * D, (1, D))
    ws_only = lin(ks[10], 2 * D, (2 * D, D));   bs_only = lin(ks[11], 2 * D, (1, D))
    ws0 = lin(ks[12], 2 * E, (2 * E, 2 * D));   bs0 = lin(ks[13], 2 * E, (1, 2 * D))
    wskip = lin(ks[14], 4 * D, (4 * D, D));     bskip = lin(ks[15], 4 * D, (1, D))
    gamma = jnp.ones((1, D), jnp.float32)       # BatchNorm1d weight init
    beta = jnp.zeros((1, D), jnp.float32)       # BatchNorm1d bias init
    wfc2 = lin(jax.random.fold_in(key, 100), D, (D, 1))
    bfc2 = lin(jax.random.fold_in(key, 101), D, (1, 1))
    return [wb1, bb1, wb2, bb2, wv1, bv1, wv2, bv2, wfc, bfc,
            ws_only, bs_only, ws0, bs0, wskip, bskip, gamma, beta, wfc2, bfc2]


def reference(bx, vx, params, *, skip_connection=False, skip_only=False):
    """Plain-JAX mirror of the PyTorch forward (for correctness check)."""
    (wb1, bb1, wb2, bb2, wv1, bv1, wv2, bv2, wfc, bfc,
     ws_only, bs_only, ws0, bs0, wskip, bskip, gamma, beta, wfc2, bfc2) = params
    bflat = bx.reshape(B, C * E)
    vflat = vx.reshape(B, C * E)
    bo = jnp.maximum(bflat @ wb1.reshape(C * E, H) + bb1, 0.0) @ wb2 + bb2
    vo = jnp.maximum(vflat @ wv1.reshape(C * E, H) + bv1, 0.0) @ wv2 + bv2
    comb = jnp.concatenate([bo, vo], axis=1)
    if skip_only:
        out = comb @ ws_only + bs_only
    elif skip_connection:
        bsum = bx.sum(axis=1)
        skip0 = jnp.concatenate([bsum, bsum], axis=1) @ ws0 + bs0
        out = jnp.concatenate([skip0, comb], axis=1) @ wskip + bskip
    else:
        out = comb @ wfc + bfc
    mean = out.mean(axis=0, keepdims=True)
    var = ((out - mean) ** 2).mean(axis=0, keepdims=True)
    out = gamma * (out - mean) / jnp.sqrt(var + EPS) + beta
    out = jnp.maximum(out, 0.0)
    return jax.nn.sigmoid(out @ wfc2 + bfc2)


if __name__ == "__main__":
    key = jax.random.PRNGKey(0)
    kb, kv, kp = jax.random.split(key, 3)
    bacteria_input = jax.random.normal(kb, (B, C, E), jnp.float32)
    viral_input = jax.random.normal(kv, (B, C, E), jnp.float32)
    params = init_params(kp)

    # default branch (f32)
    packed = pack_params(params)
    probs = phinn_forward(bacteria_input, viral_input, packed)
    jax.block_until_ready(probs)
    assert probs.shape == (B, 1)
    ref = reference(bacteria_input, viral_input, params)
    # offline folding (w2 @ head) reassociates f32 math -> slightly looser tol
    assert jnp.allclose(probs, ref, atol=1e-4, rtol=1e-3), (probs, ref)

    # skip_connection branch (statically specialized kernel, stacked head weight)
    packed_skip = pack_params(params, skip_connection=True)
    p_skip = phinn_forward(bacteria_input, viral_input, packed_skip,
                           skip_connection=True)
    jax.block_until_ready(p_skip)
    ref_skip = reference(bacteria_input, viral_input, params, skip_connection=True)
    assert jnp.allclose(p_skip, ref_skip, atol=1e-4, rtol=1e-3), (p_skip, ref_skip)

    # skip_only branch
    packed_only = pack_params(params, skip_only=True)
    p_only = phinn_forward(bacteria_input, viral_input, packed_only,
                           skip_only=True)
    jax.block_until_ready(p_only)
    ref_only = reference(bacteria_input, viral_input, params, skip_only=True)
    assert jnp.allclose(p_only, ref_only, atol=1e-4, rtol=1e-3), (p_only, ref_only)

    # bf16 weight slab + inputs (v6e/v7x native MXU path), f32 accumulation
    packed_bf16 = pack_params(params, param_dtype=jnp.bfloat16)
    p_bf16 = phinn_forward(bacteria_input, viral_input, packed_bf16)
    jax.block_until_ready(p_bf16)
    assert jnp.allclose(p_bf16, ref, atol=3e-2, rtol=3e-2), (p_bf16, ref)

    print("KERNEL_OK")
</pallas_src>

<mosaic_0001>
module attributes {stable_mosaic.version = 11 : i64} {
  func.func @_phinn_kernel(%arg0: memref<8x128xf32, #tpu.memory_space<vmem>>, %arg1: memref<8x128xf32, #tpu.memory_space<vmem>>, %arg2: memref<320x128xf32, #tpu.memory_space<vmem>>, %arg3: memref<8x128xf32, #tpu.memory_space<vmem>>, %arg4: memref<8x1xf32, #tpu.memory_space<vmem>>) attributes {dimension_semantics = [], scalar_prefetch = 0 : i64, scratch_operands = 0 : i64, tpu.core_type = #tpu.core_type<tc>} {
    %c0 = arith.constant 0 : index
    %c0_0 = arith.constant 0 : index
    %0 = vector.load %arg0[%c0, %c0_0] : memref<8x128xf32, #tpu.memory_space<vmem>>, vector<8x128xf32>
    %c0_1 = arith.constant 0 : index
    %c0_2 = arith.constant 0 : index
    %1 = vector.load %arg1[%c0_1, %c0_2] : memref<8x128xf32, #tpu.memory_space<vmem>>, vector<8x128xf32>
    %c0_3 = arith.constant 0 : index
    %c0_4 = arith.constant 0 : index
    %2 = vector.load %arg2[%c0_3, %c0_4] : memref<320x128xf32, #tpu.memory_space<vmem>>, vector<128x32xf32>
    %c128 = arith.constant 128 : index
    %c0_5 = arith.constant 0 : index
    %3 = vector.load %arg2[%c128, %c0_5] : memref<320x128xf32, #tpu.memory_space<vmem>>, vector<128x32xf32>
    %c256 = arith.constant 256 : index
    %c0_6 = arith.constant 0 : index
    %4 = vector.load %arg2[%c256, %c0_6] : memref<320x128xf32, #tpu.memory_space<vmem>>, vector<64x16xf32>
    %c0_7 = arith.constant 0 : index
    %c0_8 = arith.constant 0 : index
    %5 = vector.load %arg3[%c0_7, %c0_8] : memref<8x128xf32, #tpu.memory_space<vmem>>, vector<8x128xf32>
    %6 = vector.extract_strided_slice %5 {offsets = [0, 0], sizes = [1, 64], strides = [1, 1]} : vector<8x128xf32> to vector<1x64xf32>
    %7 = vector.extract_strided_slice %5 {offsets = [1, 0], sizes = [1, 16], strides = [1, 1]} : vector<8x128xf32> to vector<1x16xf32>
    %8 = vector.extract_strided_slice %5 {offsets = [2, 0], sizes = [1, 16], strides = [1, 1]} : vector<8x128xf32> to vector<1x16xf32>
    %9 = vector.extract_strided_slice %5 {offsets = [3, 0], sizes = [1, 16], strides = [1, 1]} : vector<8x128xf32> to vector<1x16xf32>
    %10 = vector.extract_strided_slice %5 {offsets = [4, 0], sizes = [1, 16], strides = [1, 1]} : vector<8x128xf32> to vector<1x16xf32>
    %11 = vector.extract_strided_slice %5 {offsets = [5, 0], sizes = [1, 1], strides = [1, 1]} : vector<8x128xf32> to vector<1x1xf32>
    %cst = arith.constant dense<0.000000e+00> : vector<8x32xf32>
    %12 = tpu.matmul %0, %2, %cst {dimension_numbers = #tpu.dot_dimension_numbers<[1], [0], [0], [1], [0, 0, 1, 1], [], []>} : vector<8x128xf32>, vector<128x32xf32>, vector<8x32xf32> -> vector<8x32xf32>
    %cst_9 = arith.constant dense<0.000000e+00> : vector<8x32xf32>
    %13 = tpu.matmul %1, %3, %cst_9 {dimension_numbers = #tpu.dot_dimension_numbers<[1], [0], [0], [1], [0, 0, 1, 1], [], []>} : vector<8x128xf32>, vector<128x32xf32>, vector<8x32xf32> -> vector<8x32xf32>
    %14 = tpu.concatenate %12, %13 in 1 : vector<8x32xf32>, vector<8x32xf32> -> vector<8x64xf32>
    %15 = vector.broadcast %6 : vector<1x64xf32> to vector<8x64xf32>
    %16 = arith.addf %14, %15 : vector<8x64xf32>
    %cst_10 = arith.constant 0.000000e+00 : f32
    %17 = vector.broadcast %cst_10 : f32 to vector<8x64xf32>
    %18 = arith.maximumf %16, %17 : vector<8x64xf32>
    %cst_11 = arith.constant dense<0.000000e+00> : vector<8x16xf32>
    %19 = tpu.matmul %18, %4, %cst_11 {dimension_numbers = #tpu.dot_dimension_numbers<[1], [0], [0], [1], [0, 0, 1, 1], [], []>} : vector<8x64xf32>, vector<64x16xf32>, vector<8x16xf32> -> vector<8x16xf32>
    %20 = vector.broadcast %7 : vector<1x16xf32> to vector<8x16xf32>
    %21 = arith.addf %19, %20 : vector<8x16xf32>
    %cst_12 = arith.constant dense<0.000000e+00> : vector<16xf32>
    %22 = vector.multi_reduction <add>, %21, %cst_12 [0] : vector<8x16xf32> to vector<16xf32>
    %23 = vector.shape_cast %22 : vector<16xf32> to vector<1x16xf32>
    %cst_13 = arith.constant 8.000000e+00 : f32
    %24 = vector.broadcast %cst_13 : f32 to vector<1x16xf32>
    %25 = arith.divf %23, %24 : vector<1x16xf32>
    %26 = vector.broadcast %25 : vector<1x16xf32> to vector<8x16xf32>
    %27 = arith.subf %21, %26 : vector<8x16xf32>
    %28 = arith.mulf %27, %27 : vector<8x16xf32>
    %cst_14 = arith.constant dense<0.000000e+00> : vector<16xf32>
    %29 = vector.multi_reduction <add>, %28, %cst_14 [0] : vector<8x16xf32> to vector<16xf32>
    %30 = vector.shape_cast %29 : vector<16xf32> to vector<1x16xf32>
    %cst_15 = arith.constant 8.000000e+00 : f32
    %31 = vector.broadcast %cst_15 : f32 to vector<1x16xf32>
    %32 = arith.divf %30, %31 : vector<1x16xf32>
    %cst_16 = arith.constant 9.99999974E-6 : f32
    %33 = vector.broadcast %cst_16 : f32 to vector<1x16xf32>
    %34 = arith.addf %32, %33 : vector<1x16xf32>
    %35 = math.rsqrt %34 : vector<1x16xf32>
    %36 = arith.mulf %8, %35 : vector<1x16xf32>
    %37 = arith.mulf %25, %36 : vector<1x16xf32>
    %38 = arith.subf %9, %37 : vector<1x16xf32>
    %39 = vector.broadcast %36 : vector<1x16xf32> to vector<8x16xf32>
    %40 = arith.mulf %21, %39 : vector<8x16xf32>
    %41 = vector.broadcast %38 : vector<1x16xf32> to vector<8x16xf32>
    %42 = arith.addf %40, %41 : vector<8x16xf32>
    %cst_17 = arith.constant 0.000000e+00 : f32
    %43 = vector.broadcast %cst_17 : f32 to vector<8x16xf32>
    %44 = arith.maximumf %42, %43 : vector<8x16xf32>
    %45 = vector.broadcast %10 : vector<1x16xf32> to vector<8x16xf32>
    %46 = arith.mulf %44, %45 : vector<8x16xf32>
    %cst_18 = arith.constant dense<0.000000e+00> : vector<8xf32>
    %47 = vector.multi_reduction <add>, %46, %cst_18 [1] : vector<8x16xf32> to vector<8xf32>
    %48 = vector.shape_cast %47 : vector<8xf32> to vector<8x1xf32>
    %49 = vector.broadcast %11 : vector<1x1xf32> to vector<8x1xf32>
    %50 = arith.addf %48, %49 : vector<8x1xf32>
    %51 = arith.negf %50 : vector<8x1xf32>
    %52 = math.exp %51 : vector<8x1xf32>
    %cst_19 = arith.constant 1.000000e+00 : f32
    %53 = vector.broadcast %cst_19 : f32 to vector<8x1xf32>
    %54 = arith.addf %53, %52 : vector<8x1xf32>
    %55 = arith.divf %53, %54 : vector<8x1xf32>
    %c0_20 = arith.constant 0 : index
    %c0_21 = arith.constant 0 : index
    %56 = vector.load %arg4[%c0_20, %c0_21] : memref<8x1xf32, #tpu.memory_space<vmem>>, vector<8x1xf32>
    tpu.vector_store %arg4[%c0_20, %c0_21], %55 {strides = array<i32>} : memref<8x1xf32, #tpu.memory_space<vmem>>, vector<8x1xf32>,
    return
  }
}

</mosaic_0001>

<bundles_post_ra>
// kernel: tpu_custom_call.1
= control target key start
LH: loop header
LB: loop body
LE: loop exit
PB: predicated region body
PF: predicated region fallthrough
CT: control target
= control target key end

     0   :  { %9 = vsyncpa [#allocation3], 0  ;;  %s777_s0 = inlined_call_operand.hbm [shape: f32[8,128], index: 0, kind: input, shape index: {}]   ;;  %s778_s1 = inlined_call_operand.hbm [shape: f32[8,128], index: 1, kind: input, shape index: {}]   ;;  %s779_s2 = inlined_call_operand.hbm [shape: f32[320,128], index: 2, kind: input, shape index: {}]   ;;  %s780_s3 = inlined_call_operand.vmem [shape: f32[8,128], index: 3, kind: input, shape index: {}]   ;;  %s781_s4 = inlined_call_operand.vmem [shape: f32[8,1], index: 4, kind: output, shape index: {}]  }
   0x1   :  { %10 = vsyncpa [#allocation5], 0  ;;  %s672_s15 = smov [#allocation4]   ;;  %s673_s17 = smov [#allocation2]  }
   0x2   :  { %s27_s16 = sshll.u32 %s672_s15, 4  ;;  %s17_s18 = sshll.u32 %s673_s17, 4  ;;  %s28_s16 = int_to_ptr.vmem [resolvable:$true] %s27_s16  ;;  %s18_s18 = int_to_ptr.vmem [resolvable:$true] %s17_s18 }
   0x3   :  { %s602_s21 = scalar_lea.hbm %s778_s1, 128 }
   0x4   :  { %p603_p0 = scmp.ne.s32.totalorder %s778_s1, %s602_s21  ;;  %p606_p1 = scmp.lt.u32.totalorder %s602_s21, %s778_s1 }
   0x6   :  { %p608_p2 = pnand %p606_p1, %p603_p0 }
   0x8   :  { %611 = shalt.err (!%p608_p2)
}
   0x9   :  { %s612_s26 = scalar_lea.vmem %s28_s16, 128  ;;  %p617_p4 = scmp.lt.s32.totalorder %s28_s16, %s28_s16 }
   0xa   :  { %p613_p3 = scmp.ne.s32.totalorder %s28_s16, %s612_s26  ;;  %p618_p5 = scmp.lt.s32.totalorder %s612_s26, %s612_s26 }
   0xc   :  { %p619_p6 = por %p618_p5, %p617_p4 }
   0xe   :  { %p620_p7 = pnand %p619_p6, %p613_p3 }
  0x10   :  { %623 = shalt.err (!%p620_p7)
}
  0x11   :  { %30 = dma.hbm_to_vmem [thread:$0]  %s778_s1, 128, %s28_s16, [#allocation5]  }
  0x12   :  { %s624_s5 = scalar_lea.hbm %s777_s0, 128 }
  0x13   :  { %p625_p8 = scmp.ne.s32.totalorder %s777_s0, %s624_s5  ;;  %p628_p9 = scmp.lt.u32.totalorder %s624_s5, %s777_s0 }
  0x15   :  { %p630_p10 = pnand %p628_p9, %p625_p8 }
  0x17   :  { %633 = shalt.err (!%p630_p10)
}
  0x18   :  { %s634_s10 = scalar_lea.vmem %s18_s18, 128  ;;  %p639_p12 = scmp.lt.s32.totalorder %s18_s18, %s18_s18 }
  0x19   :  { %p635_p11 = scmp.ne.s32.totalorder %s18_s18, %s634_s10  ;;  %p640_p13 = scmp.lt.s32.totalorder %s634_s10, %s634_s10 }
  0x1b   :  { %p641_p0 = por %p640_p13, %p639_p12 }
  0x1d   :  { %p642_p1 = pnand %p641_p0, %p635_p11 }
  0x1f   :  { %645 = shalt.err (!%p642_p1)
}
  0x20   :  { %20 = dma.hbm_to_vmem [thread:$0]  %s777_s0, 128, %s18_s18, [#allocation3]  }
  0x21   :  { %s674_s12 = smov [#allocation6]   ;;  %s646_s16 = scalar_lea.hbm %s779_s2, 5120 }
  0x22   :  { %s36_s13 = sshll.u32 %s674_s12, 4  ;;  %p647_p2 = scmp.ne.s32.totalorder %s779_s2, %s646_s16  ;;  %s37_s13 = int_to_ptr.vmem [resolvable:$true] %s36_s13 }
  0x23   :  { %p650_p3 = scmp.lt.u32.totalorder %s646_s16, %s779_s2 }
  0x25   :  { %p652_p4 = pnand %p650_p3, %p647_p2 }
  0x27   :  { %655 = shalt.err (!%p652_p4)
}
  0x28   :  { %s656_s22 = scalar_lea.vmem %s37_s13, 5120  ;;  %p661_p6 = scmp.lt.s32.totalorder %s37_s13, %s37_s13 }
  0x29   :  { %p657_p5 = scmp.ne.s32.totalorder %s37_s13, %s656_s22  ;;  %p662_p7 = scmp.lt.s32.totalorder %s656_s22, %s656_s22 }
  0x2b   :  { %p663_p8 = por %p662_p7, %p661_p6 }
  0x2d   :  { %p664_p9 = pnand %p663_p8, %p657_p5 }
  0x2f   :  { %667 = shalt.err (!%p664_p9)
}
  0x30   :  { %s675_s0 = smov 128   ;;  %s676_s18 = smov 8  }
  0x31   :  { %42 = dma.hbm_to_vmem [thread:$0]  %s779_s2, 5120, %s37_s13, [#allocation5], %s675_s0, %s675_s0, %s676_s18  }
  0x32   :  { %668 = dma.done.wait [#allocation3], 128  }
  0x33   :  { %669 = vsyncadd [#allocation3], 4294967168 }
  0x34   :  { %670 = dma.done.wait [#allocation5], 5248  }
  0x35   :  { %671 = vsyncadd [#allocation5], 4294962048  ;;  %v677_v0 = vmov 0.0|0.0   ;;  %vm678_vm0 = vmmov 0   ;;  %v679_v1 = vmov 0.0   ;;  %v72_v2 = vld [vmem:[#allocation6 + $0x80] sm:$0xff] }
  0x36   :  { %551 = vmatprep.subr.bf16.mxu1 %v677_v0  ;;  %505 = vmatprep.mubr.msk.f32.mxu1 %vm678_vm0, %v679_v1  ;;  %v73_v3 = vld [vmem:[#allocation6 + $0x88] sm:$0xff]  ;;  %v74_v4 = vld [vmem:[#allocation6 + $0x90] sm:$0xff]  ;;  %v75_v6 = vld [vmem:[#allocation6 + $0x98] sm:$0xff]  ;;  %s680_s2 = smov 32   ;;  %vm241_vm1 = vcmask 261120   ;;  %vm253_vm2 = vcmask 523264  }
  0x37   :  { %527 = vmatprep.subr.bf16.mxu0 %v677_v0  ;;  %470 = vmatprep.mubr.msk.f32.mxu0 %vm678_vm0, %v679_v1  ;;  %v552_v5 = vpack.c.bf16 %v73_v3, %v72_v2  ;;  %v555_v7 = vpack.c.bf16 %v75_v6, %v74_v4  ;;  %v76_v8 = vld [vmem:[#allocation6 + $0xa0] sm:$0xff]  ;;  %v77_v9 = vld [vmem:[#allocation6 + $0xa8] sm:$0xff]  ;;  %v58_v12 = vld [vmem:[#allocation6 + $0x10] sm:$0xff]  ;;  %vm327_vm3 = vcmask 130048   ;;  %vm385_vm4 = vcmask 7168  }
  0x38   :  { %v56_v10 = vld [vmem:[#allocation6] sm:$0xff]  ;;  %v57_v11 = vld [vmem:[#allocation6 + $0x8] sm:$0xff]  ;;  %v59_v13 = vld [vmem:[#allocation6 + $0x18] sm:$0xff]  ;;  %v558_v14 = vpack.c.bf16 %v77_v9, %v76_v8 }
  0x39   :  { %553 = vmatpush3.bf16.msra.mxu1 %v552_v5  ;;  %v528_v15 = vpack.c.bf16 %v57_v11, %v56_v10  ;;  %v78_v16 = vld [vmem:[#allocation6 + $0xb0] sm:$0xff]  ;;  %v79_v17 = vld [vmem:[#allocation6 + $0xb8] sm:$0xff]  ;;  %v531_v18 = vpack.c.bf16 %v59_v13, %v58_v12  ;;  %v60_v19 = vld [vmem:[#allocation6 + $0x20] sm:$0xff]  ;;  %v243_v5 = vlaneseq }
  0x3a   :  { %554 = vmatprep.subr.bf16.mxu1 %v677_v0  ;;  %v61_v20 = vld [vmem:[#allocation6 + $0x28] sm:$0xff]  ;;  %v561_v21 = vpack.c.bf16 %v79_v17, %v78_v16  ;;  %v80_v22 = vld [vmem:[#allocation6 + $0xc0] sm:$0xff]  ;;  %v62_v25 = vld [vmem:[#allocation6 + $0x30] sm:$0xff] }
  0x3b   :  { %529 = vmatpush3.bf16.msra.mxu0 %v528_v15  ;;  %v81_v23 = vld [vmem:[#allocation6 + $0xc8] sm:$0xff]  ;;  %v534_v24 = vpack.c.bf16 %v61_v20, %v60_v19  ;;  %v63_v26 = vld [vmem:[#allocation6 + $0x38] sm:$0xff]  ;;  %v82_v28 = vld [vmem:[#allocation6 + $0xd0] sm:$0xff]  ;;  %v244_v6 = vshrl.u32 %v243_v5, 7 }
  0x3c   :  { %530 = vmatprep.subr.bf16.mxu0 %v677_v0  ;;  %v564_v27 = vpack.c.bf16 %v81_v23, %v80_v22  ;;  %v83_v29 = vld [vmem:[#allocation6 + $0xd8] sm:$0xff]  ;;  %v537_v30 = vpack.c.bf16 %v63_v26, %v62_v25  ;;  %v64_v31 = vld [vmem:[#allocation6 + $0x40] sm:$0xff]  ;;  %v65_v32 = vld [vmem:[#allocation6 + $0x48] sm:$0xff] }
  0x3d   :  { %556 = vmatpush3.bf16.msra.mxu1 %v555_v7  ;;  %v567_v33 = vpack.c.bf16 %v83_v29, %v82_v28  ;;  %v84_v34 = vld [vmem:[#allocation6 + $0xe0] sm:$0xff]  ;;  %v85_v35 = vld [vmem:[#allocation6 + $0xe8] sm:$0xff]  ;;  %v540_v36 = vpack.c.bf16 %v65_v32, %v64_v31  ;;  %v66_v37 = vld [vmem:[#allocation6 + $0x50] sm:$0xff]  ;;  %v245_v7 = vsub.s32 0, %v244_v6  ;;  %v251_v13 = vsub.s32 1, %v244_v6 }
  0x3e   :  { %557 = vmatprep.subr.bf16.mxu1 %v677_v0  ;;  %v67_v38 = vld [vmem:[#allocation6 + $0x58] sm:$0xff]  ;;  %v570_v39 = vpack.c.bf16 %v85_v35, %v84_v34  ;;  %v86_v40 = vld [vmem:[#allocation6 + $0xf0] sm:$0xff]  ;;  %v68_v43 = vld [vmem:[#allocation6 + $0x60] sm:$0xff] }
  0x3f   :  { %532 = vmatpush3.bf16.msra.mxu0 %v531_v18  ;;  %v87_v41 = vld [vmem:[#allocation6 + $0xf8] sm:$0xff]  ;;  %v543_v42 = vpack.c.bf16 %v67_v38, %v66_v37  ;;  %v69_v44 = vld [vmem:[#allocation6 + $0x68] sm:$0xff]  ;;  %v70_v47 = vld [vmem:[#allocation6 + $0x70] sm:$0xff] }
  0x40   :  { %533 = vmatprep.subr.bf16.mxu0 %v677_v0  ;;  %v573_v45 = vpack.c.bf16 %v87_v41, %v86_v40  ;;  %v546_v46 = vpack.c.bf16 %v69_v44, %v68_v43  ;;  %v71_v48 = vld [vmem:[#allocation6 + $0x78] sm:$0xff]  ;;  %v54_v51 = vld [vmem:[#allocation2] sm:$0xff]  ;;  %v88_v52 = vld [vmem:[#allocation6 + $0x100] sm:$0xff]  ;;  %v362_v43 = vsub.s32 3, %v244_v6 }
  0x41   :  { %559 = vmatpush3.bf16.msra.mxu1 %v558_v14  ;;  %v55_v49 = vld [vmem:[#allocation4] sm:$0xff]  ;;  %v549_v50 = vpack.c.bf16 %v71_v48, %v70_v47  ;;  %v89_v53 = vld [vmem:[#allocation6 + $0x108] sm:$0xff]  ;;  %v90_v54 = vld [vmem:[#allocation6 + $0x110] sm:$0xff] }
  0x42   :  { %560 = vmatprep.subr.bf16.mxu1 %v677_v0  ;;  %v576_v55 = vpack.c.bf16 %v89_v53, %v88_v52  ;;  %v91_v56 = vld [vmem:[#allocation6 + $0x118] sm:$0xff]  ;;  %v92_v58 = vld [vmem:[#allocation6 + $0x120] sm:$0xff]  ;;  %v93_v59 = vld [vmem:[#allocation6 + $0x128] sm:$0xff]  ;;  %v376_v53 = vsub.s32 5, %v244_v6 }
  0x43   :  { %535 = vmatpush3.bf16.msra.mxu0 %v534_v24  ;;  %v579_v57 = vpack.c.bf16 %v91_v56, %v90_v54  ;;  %v582_v60 = vpack.c.bf16 %v93_v59, %v92_v58  ;;  %v94_v61 = vld [vmem:[#allocation6 + $0x130] sm:$0xff]  ;;  %v95_v62 = vld [vmem:[#allocation6 + $0x138] sm:$0xff]  ;;  %v96_v8 = vld [vmem:[%s780_s3] sm:$0xff] }
  0x44   :  { %536 = vmatprep.subr.bf16.mxu0 %v677_v0  ;;  %v585_v63 = vpack.c.bf16 %v95_v62, %v94_v61  ;;  %v246_v9 = vrot.slane %v96_v8, %v245_v7  ;;  %v252_v14 = vrot.slane %v96_v8, %v251_v13  ;;  %v377_v54 = vrot.slane %v96_v8, %v376_v53 }
  0x45   :  { %562 = vmatpush3.bf16.msra.mxu1 %v561_v21 }
  0x46   :  { %563 = vmatprep.subr.bf16.mxu1 %v677_v0 }
  0x47   :  { %538 = vmatpush3.bf16.msra.mxu0 %v537_v30 }
  0x48   :  { %539 = vmatprep.subr.bf16.mxu0 %v677_v0 }
  0x49   :  { %565 = vmatpush3.bf16.msra.mxu1 %v564_v27 }
  0x4a   :  { %566 = vmatprep.subr.bf16.mxu1 %v677_v0 }
  0x4b   :  { %541 = vmatpush3.bf16.msra.mxu0 %v540_v36 }
  0x4c   :  { %542 = vmatprep.subr.bf16.mxu0 %v677_v0 }
  0x4d   :  { %568 = vmatpush3.bf16.msra.mxu1 %v567_v33 }
  0x4e   :  { %569 = vmatprep.subr.bf16.mxu1 %v677_v0 }
  0x4f   :  { %544 = vmatpush3.bf16.msra.mxu0 %v543_v42 }
  0x50   :  { %545 = vmatprep.subr.bf16.mxu0 %v677_v0 }
  0x51   :  { %571 = vmatpush3.bf16.msra.mxu1 %v570_v39  ;;  %v357_v39 = vsub.s32 2, %v244_v6 }
  0x52   :  { %572 = vmatprep.subr.bf16.mxu1 %v677_v0 }
  0x53   :  { %547 = vmatpush3.bf16.msra.mxu0 %v546_v46 }
  0x54   :  { %548 = vmatprep.subr.bf16.mxu0 %v677_v0 }
  0x55   :  { %574 = vmatpush3.bf16.msra.mxu1 %v573_v45  ;;  %v368_v45 = vsub.s32 4, %v244_v6 }
  0x57   :  { %550 = vmatpush3.bf16.msra.mxu0 %v549_v50 }
  0x58   :  { %506 = vmatmul.mubr.f32.vlgmr.msra.gmra.mrb[0].mxu1 %v55_v49  ;;  %575 = vmatprep.subr.bf16.mxu0 %v677_v0  ;;  %v369_v49 = vrot.slane %v96_v8, %v368_v45 }
  0x5a   :  { %471 = vmatmul.mubr.f32.vlgmr.msra.gmra.mrb[0].mxu0 %v54_v51 }
  0x5b   :  { %524 = vmatprep.mubr.msk.f32.mxu0 %vm678_vm0, %v679_v1  ;;  %577 = vmatpush3.bf16.msra.mxu0 %v576_v55 }
  0x5c   :  { %578 = vmatprep.subr.bf16.mxu0 %v677_v0 }
  0x5f   :  { %580 = vmatpush3.bf16.msra.mxu0 %v579_v57 }
  0x60   :  { %581 = vmatprep.subr.bf16.mxu0 %v677_v0 }
  0x63   :  { %583 = vmatpush3.bf16.msra.mxu0 %v582_v60 }
  0x64   :  { %584 = vmatprep.subr.bf16.mxu0 %v677_v0 }
  0x67   :  { %586 = vmatpush3.bf16.msra.mxu0 %v585_v63 }
 0x12b   :  { %v233_v1 = vpop.f32.mrb[0].mxu1 }
 0x12c   :  { %238 = vrot.lane.b32.xlu0 %v233_v1, %s680_s2  ;;  %v507_v2 = vpop.f32.mrb[1].mxu1 }
 0x12d   :  { %v163_v3 = vpop.f32.mrb[0].mxu0 }
 0x12e   :  { %v472_v4 = vpop.f32.mrb[1].mxu0 }
 0x19e   :  { %v239_v0 = vpop.permute.xlu0 %238 }
 0x19f   :  { %v242_v10 = vsel %vm241_vm1, %v163_v3, %v239_v0 }
 0x1a0   :  { %v247_v11 = vadd.f32 %v246_v9, %v242_v10 }
 0x1a2   :  { %v248_v12 = vmax.f32 %v247_v11, 0.0 }
 0x1a4   :  { %525 = vmatmul.mubr.msk.f32.vlgmr.msra.gmra.mrb[2].mxu0 %vm253_vm2, %v248_v12 }
 0x277   :  { %v323_v15 = vpop.f32.mrb[2].mxu0 }
 0x278   :  { %v324_v16 = vadd.f32 %v323_v15, %v252_v14  ;;  %v526_v17 = vpop.f32.mrb[3].mxu0 }
 0x27a   :  { %v328_v18 = vsel %vm327_vm3, %v324_v16, 0.0 }
 0x27b   :  { %v329_v19 = vrot.slane %v328_v18, 4 }
 0x27d   :  { %v330_v20 = vadd.f32 %v329_v19, %v328_v18 }
 0x27f   :  { %v331_v21 = vrot.slane %v330_v20, 2 }
 0x281   :  { %v332_v22 = vadd.f32 %v331_v21, %v330_v20 }
 0x283   :  { %v333_v23 = vrot.slane %v332_v22, 1 }
 0x285   :  { %v334_v24 = vadd.f32 %v333_v23, %v332_v22 }
 0x287   :  { %v336_v25 = vmul.f32 0.125, %v334_v24 }
 0x289   :  { %v337_v26 = vsub.f32 %v324_v16, %v336_v25 }
 0x28b   :  { %v338_v27 = vmul.f32 %v337_v26, %v337_v26 }
 0x28d   :  { %v339_v28 = vsel %vm327_vm3, %v338_v27, 0.0 }
 0x28e   :  { %v340_v29 = vrot.slane %v339_v28, 4 }
 0x290   :  { %v341_v30 = vadd.f32 %v340_v29, %v339_v28 }
 0x292   :  { %v342_v31 = vrot.slane %v341_v30, 2 }
 0x294   :  { %v343_v32 = vadd.f32 %v342_v31, %v341_v30 }
 0x296   :  { %v344_v33 = vrot.slane %v343_v32, 1 }
 0x298   :  { %v345_v34 = vadd.f32 %v344_v33, %v343_v32 }
 0x29a   :  { %v346_v35 = vmul.f32 0.125, %v345_v34 }
 0x29c   :  { %v347_v36 = vadd.f32 1e-05, %v346_v35 }
 0x29e   :  { %596 = vrsqrt.f32 %v347_v36 }
 0x2a8   :  { %v597_v37 = vpop.eup %596 }
 0x2a9   :  { %v349_v38 = vmul.f32 %v597_v37, %v96_v8 }
 0x2ab   :  { %v350_v40 = vmul.f32 %v349_v38, %v336_v25  ;;  %v358_v42 = vrot.slane %v349_v38, %v357_v39 }
 0x2ad   :  { %v352_v41 = vrot.slane %v350_v40, 7  ;;  %v359_v46 = vmul.f32 %v358_v42, %v324_v16 }
 0x2af   :  { %v354_v44 = vsub.f32 %v96_v8, %v352_v41 }
 0x2b1   :  { %v363_v47 = vrot.slane %v354_v44, %v362_v43 }
 0x2b3   :  { %v364_v48 = vadd.f32 %v363_v47, %v359_v46 }
 0x2b5   :  { %v365_v50 = vmax.f32 %v364_v48, 0.0 }
 0x2b7   :  { %v370_v51 = vmul.f32 %v369_v49, %v365_v50 }
 0x2b9   :  { %v371_v52 = vsel %vm327_vm3, %v370_v51, 0.0 }
 0x2ba   :  { %372 = vadd.xlane.f32.xlu0 %v371_v52 }
 0x347   :  { %v373_v55 = vpop.xlane.xlu0 %372 }
 0x348   :  { %v378_v56 = vadd.f32 %v377_v54, %v373_v55 }
 0x34a   :  { %v394_v57 = vmul.f32 -1.442695, %v378_v56 }
 0x34c   :  { %598 = vpow2.f32 %v394_v57 }
 0x356   :  { %v599_v58 = vpop.eup %598 }
 0x357   :  { %v382_v59 = vadd.f32 1.0, %v599_v58 }
 0x359   :  { %600 = vrcp.f32 %v382_v59 }
 0x363   :  { %v601_v60 = vpop.eup %600 }
 0x364   :  { %386 = vst.msk [vmem:[%s781_s4] sm:$0xff] %vm385_vm4, %v601_v60 }
 0x365   :  { %391 = vsyncpa [#allocation3], 1 }
 0x366   :  { %392 = vsyncpa [#allocation5], 1 }

</bundles_post_ra>
